<compile_context>
chip_gen: v7x
topology: tpu7x:2x2x1
jax: 0.10.0
libtpu: 0.0.40
codegen_flags: <defaults>
</compile_context>

<pallas_src>
import functools

import jax
import jax.numpy as jnp
from jax.experimental import pallas as pl
from jax.experimental.pallas import tpu as pltpu


def _round_up(x, m):
    return ((x + m - 1) // m) * m


def _total_loss_kernel(sp_ref, sn_ref, lab_ref, acc_ref, *,
                       inv_c, n, tl, bps, padded):
    """One lane-block: scores are (c, tl) with batch on lanes, classes on sublanes."""
    i = pl.program_id(1)                       # lane-block index within this core

    @pl.when(i == 0)
    def _init():
        acc_ref[...] = jnp.zeros_like(acc_ref)

    sp = sp_ref[...].astype(jnp.float32)       # (c, tl)
    sn = sn_ref[...].astype(jnp.float32)       # (c, tl)
    labels = lab_ref[...]                      # (1, tl) int32

    # ---- per-sample (per-lane) log-sum-exp over classes (sublane axis) ----
    m_p = jnp.max(sp, axis=0, keepdims=True)                       # (1, tl)
    lse_p = jnp.log(jnp.sum(jnp.exp(sp - m_p), axis=0, keepdims=True)) + m_p
    m_n = jnp.max(sn, axis=0, keepdims=True)
    lse_n = jnp.log(jnp.sum(jnp.exp(sn - m_n), axis=0, keepdims=True)) + m_n

    # ---- gather logits at the labels via sublane-iota one-hot ----
    cls_iota = jax.lax.broadcasted_iota(jnp.int32, sp.shape, 0)     # (c, tl)
    onehot = (cls_iota == labels).astype(jnp.float32)
    picked = jnp.sum(sp * onehot, axis=0, keepdims=True)            # (1, tl)
    sum_n = jnp.sum(sn, axis=0, keepdims=True)                      # (1, tl)

    # Algebraic CE / mean-log-softmax (no log_softmax matrices materialized).
    pos_c = lse_p - picked                                          # (1, tl)
    neg_c = lse_n - sum_n * jnp.float32(inv_c)                      # (1, tl)

    if padded:
        s = pl.program_id(0)
        start = (s * bps + i) * tl            # first global sample in this block
        has_pad = start + tl > n              # trace: only real pad blocks mask

        @pl.when(jnp.logical_not(has_pad))
        def _dense():
            acc_ref[0:1, :] += pos_c
            acc_ref[1:2, :] += neg_c

        @pl.when(has_pad)
        def _masked():
            lane = jax.lax.broadcasted_iota(jnp.int32, (1, tl), 1)
            keep = ((start + lane) < n).astype(jnp.float32)
            acc_ref[0:1, :] += pos_c * keep
            acc_ref[1:2, :] += neg_c * keep
    else:
        acc_ref[0:1, :] += pos_c
        acc_ref[1:2, :] += neg_c


def total_loss_pallas(netoutput, labels):
    """Mirror of TotalLoss.forward. netoutput = (out_pos, out_neg, _, _, _)."""
    (scores_pos, _maps_pos), (scores_neg, _maps_neg), _, _, _ = netoutput
    n, c = scores_pos.shape
    dtype = scores_pos.dtype
    itemsize = jnp.dtype(dtype).itemsize

    # ---- lane-tile sizing from PADDED VMEM bytes ----
    sublane_mult = 8 * max(1, 4 // itemsize)       # f32 -> 8, bf16 -> 16, int8 -> 32
    c_pad = _round_up(c, sublane_mult)
    # Per lane of a tile: two score inputs (double-buffered, c_pad sublanes)
    # + labels block ((1,TL) i32 padded to 8 sublanes, double-buffered)
    # + (2,TL) f32 output accumulator padded to 8 sublanes (counted x2 slack).
    bytes_per_lane = 2 * 2 * c_pad * itemsize + 2 * 8 * 4 + 2 * 8 * 4
    budget = 24 * 1024 * 1024                      # headroom under the 32 MiB scoped VMEM
    tl_cap = max(128, min(8192, (budget // bytes_per_lane) // 128 * 128))

    # ---- split batch over (up to) 2 TensorCores, then over lane blocks ----
    num_splits = 2 if _round_up(n, 128) >= 256 else 1
    per_core = -(-n // num_splits)
    per_core_pad = _round_up(per_core, 128)
    if per_core_pad <= tl_cap:
        tl, bps = per_core_pad, 1
    else:
        bps = -(-per_core_pad // tl_cap)
        tl = _round_up(-(-per_core // bps), 128)
    n_padded = num_splits * bps * tl

    # ---- lane-dense repack: batch -> lanes, classes -> sublanes (native dtype) ----
    sp_t = scores_pos.T                            # (c, n)
    sn_t = scores_neg.T
    lab = labels.astype(jnp.int32)
    if n_padded != n:
        pad = n_padded - n
        sp_t = jnp.pad(sp_t, ((0, 0), (0, pad)))   # zero-padded columns
        sn_t = jnp.pad(sn_t, ((0, 0), (0, pad)))
        lab = jnp.pad(lab, (0, pad))
    lab = lab.reshape(1, n_padded)

    kernel = functools.partial(
        _total_loss_kernel,
        inv_c=1.0 / c, n=n, tl=tl, bps=bps, padded=(n_padded != n))

    cost = pl.CostEstimate(
        flops=10 * n_padded * c,
        transcendentals=2 * n_padded * c + 2 * n_padded,
        bytes_accessed=(2 * n_padded * c * itemsize + n_padded * 4
                        + num_splits * 2 * tl * 4))

    block_bytes = bytes_per_lane * tl
    vmem_limit = int(min(max(32 << 20, block_bytes + (4 << 20)), 64 << 20))

    score_spec_a = pl.BlockSpec((c, tl), lambda s, i: (0, s * bps + i))
    score_spec_b = pl.BlockSpec((c, tl), lambda s, i: (0, s * bps + i))
    label_spec = pl.BlockSpec((1, tl), lambda s, i: (0, s * bps + i))
    # Per-core accumulator lives in the output block: resident across the
    # "arbitrary" axis, distinct per "parallel" core index.
    out_spec = pl.BlockSpec((None, 2, tl), lambda s, i: (s, 0, 0))

    out = pl.pallas_call(
        kernel,
        out_shape=jax.ShapeDtypeStruct((num_splits, 2, tl), jnp.float32),
        grid=(num_splits, bps),
        in_specs=[score_spec_a, score_spec_b, label_spec],
        out_specs=out_spec,
        compiler_params=pltpu.CompilerParams(
            dimension_semantics=("parallel", "arbitrary"),
            vmem_limit_bytes=vmem_limit),
        cost_estimate=cost,
    )(sp_t, sn_t, lab)

    # Final add of per-core partials + cross-lane reduce + 1/n scaling (tiny,
    # fuses into one small XLA op).
    sums = jnp.sum(out, axis=(0, 2))               # (2,) = [sum_pos, sum_neg]
    inv_n = jnp.float32(1.0 / n)
    loss_pos = sums[0] * inv_n
    loss_neg = sums[1] * inv_n
    total = loss_pos + loss_neg
    # .squeeze() in the PyTorch forward -> scalars
    return total, loss_pos, loss_neg


def _reference(netoutput, labels):
    (sp, _), (sn, _), _, _, _ = netoutput
    sp = sp.astype(jnp.float32)
    sn = sn.astype(jnp.float32)
    logp_pos = jax.nn.log_softmax(sp, axis=1)
    loss_pos = -jnp.mean(jnp.take_along_axis(
        logp_pos, labels.astype(jnp.int32)[:, None], axis=1))
    loss_neg = -jnp.mean(jnp.mean(jax.nn.log_softmax(sn, axis=1), axis=1))
    return loss_pos + loss_neg, loss_pos, loss_neg


def _run_case(key, n, c, spatial):
    k1, k2, k3, k4, k5 = jax.random.split(key, 5)
    scores_pos = jax.random.normal(k1, (n, c), dtype=jnp.float32)
    scores_neg = jax.random.normal(k2, (n, c), dtype=jnp.float32)
    # maps are unused by forward() but are part of the netoutput structure.
    maps_pos = jax.random.normal(k3, (n, 1, spatial, spatial), dtype=jnp.float32)
    maps_neg = jax.random.normal(k4, (n, 1, spatial, spatial), dtype=jnp.float32)
    labels = jax.random.randint(k5, (n,), 0, c, dtype=jnp.int32)
    netoutput = ((scores_pos, maps_pos), (scores_neg, maps_neg), None, None, None)

    total, loss_pos, loss_neg = total_loss_pallas(netoutput, labels)
    jax.block_until_ready((total, loss_pos, loss_neg))

    ref_total, ref_pos, ref_neg = _reference(netoutput, labels)
    assert jnp.allclose(total, ref_total, atol=1e-5), (total, ref_total)
    assert jnp.allclose(loss_pos, ref_pos, atol=1e-5), (loss_pos, ref_pos)
    assert jnp.allclose(loss_neg, ref_neg, atol=1e-5), (loss_neg, ref_neg)


if __name__ == "__main__":
    key = jax.random.PRNGKey(0)
    k_a, k_b = jax.random.split(key, 2)
    # Small canonical shapes (single block, single split).
    _run_case(k_a, n=8, c=4, spatial=16)
    # Ragged batch exercising the dual-split ("parallel") path + pad masking.
    _run_case(k_b, n=300, c=5, spatial=4)
    print("KERNEL_OK")
</pallas_src>

<mosaic_0001>
module attributes {stable_mosaic.version = 11 : i64} {
  func.func @_total_loss_kernel(%arg0: i32, %arg1: i32, %arg2: memref<4x128xf32, #tpu.memory_space<vmem>>, %arg3: memref<4x128xf32, #tpu.memory_space<vmem>>, %arg4: memref<1x128xi32, #tpu.memory_space<vmem>>, %arg5: memref<1x2x128xf32, #tpu.memory_space<vmem>>) attributes {dimension_semantics = [#tpu.dimension_semantics<parallel>, #tpu.dimension_semantics<arbitrary>], iteration_bounds = array<i64: 1, 1>, scalar_prefetch = 0 : i64, scratch_operands = 0 : i64, tpu.core_type = #tpu.core_type<tc>, window_params = [{transform_indices = @transform_0, window_bounds = array<i64: 4, 128>}, {transform_indices = @transform_1, window_bounds = array<i64: 4, 128>}, {transform_indices = @transform_2, window_bounds = array<i64: 1, 128>}, {transform_indices = @transform_3, window_bounds = array<i64: 1, 2, 128>}]} {
    %c0_i32 = arith.constant 0 : i32
    %0 = arith.cmpi eq, %arg1, %c0_i32 : i32
    %1 = arith.extui %0 : i1 to i32
    %c0_i32_0 = arith.constant 0 : i32
    %2 = arith.cmpi ne, %1, %c0_i32_0 : i32
    scf.if %2 {
      %cst_15 = arith.constant 0.000000e+00 : f32
      %48 = vector.broadcast %cst_15 : f32 to vector<2x128xf32>
      %c0_16 = arith.constant 0 : index
      %c0_17 = arith.constant 0 : index
      %c0_18 = arith.constant 0 : index
      %49 = vector.load %arg5[%c0_16, %c0_17, %c0_18] : memref<1x2x128xf32, #tpu.memory_space<vmem>>, vector<1x2x128xf32>
      %50 = vector.shape_cast %49 : vector<1x2x128xf32> to vector<2x128xf32>
      %51 = vector.shape_cast %48 : vector<2x128xf32> to vector<1x2x128xf32>
      tpu.vector_store %arg5[%c0_16, %c0_17, %c0_18], %51 {strides = array<i32>} : memref<1x2x128xf32, #tpu.memory_space<vmem>>, vector<1x2x128xf32>,
    } else {
    }
    %c0 = arith.constant 0 : index
    %c0_1 = arith.constant 0 : index
    %3 = vector.load %arg2[%c0, %c0_1] : memref<4x128xf32, #tpu.memory_space<vmem>>, vector<4x128xf32>
    %c0_2 = arith.constant 0 : index
    %c0_3 = arith.constant 0 : index
    %4 = vector.load %arg3[%c0_2, %c0_3] : memref<4x128xf32, #tpu.memory_space<vmem>>, vector<4x128xf32>
    %c0_4 = arith.constant 0 : index
    %c0_5 = arith.constant 0 : index
    %5 = vector.load %arg4[%c0_4, %c0_5] : memref<1x128xi32, #tpu.memory_space<vmem>>, vector<1x128xi32>
    %cst = arith.constant dense<0xFF800000> : vector<128xf32>
    %6 = vector.multi_reduction <maximumf>, %3, %cst [0] : vector<4x128xf32> to vector<128xf32>
    %7 = vector.shape_cast %6 : vector<128xf32> to vector<1x128xf32>
    %8 = vector.broadcast %7 : vector<1x128xf32> to vector<4x128xf32>
    %9 = arith.subf %3, %8 : vector<4x128xf32>
    %10 = math.exp %9 : vector<4x128xf32>
    %cst_6 = arith.constant dense<0.000000e+00> : vector<128xf32>
    %11 = vector.multi_reduction <add>, %10, %cst_6 [0] : vector<4x128xf32> to vector<128xf32>
    %12 = vector.shape_cast %11 : vector<128xf32> to vector<1x128xf32>
    %13 = math.log %12 : vector<1x128xf32>
    %14 = arith.addf %13, %7 : vector<1x128xf32>
    %cst_7 = arith.constant dense<0xFF800000> : vector<128xf32>
    %15 = vector.multi_reduction <maximumf>, %4, %cst_7 [0] : vector<4x128xf32> to vector<128xf32>
    %16 = vector.shape_cast %15 : vector<128xf32> to vector<1x128xf32>
    %17 = vector.broadcast %16 : vector<1x128xf32> to vector<4x128xf32>
    %18 = arith.subf %4, %17 : vector<4x128xf32>
    %19 = math.exp %18 : vector<4x128xf32>
    %cst_8 = arith.constant dense<0.000000e+00> : vector<128xf32>
    %20 = vector.multi_reduction <add>, %19, %cst_8 [0] : vector<4x128xf32> to vector<128xf32>
    %21 = vector.shape_cast %20 : vector<128xf32> to vector<1x128xf32>
    %22 = math.log %21 : vector<1x128xf32>
    %23 = arith.addf %22, %16 : vector<1x128xf32>
    %24 = tpu.iota {dimensions = array<i32: 0>} : vector<4x128xi32>
    %25 = vector.broadcast %5 : vector<1x128xi32> to vector<4x128xi32>
    %26 = arith.cmpi eq, %24, %25 : vector<4x128xi32>
    %27 = arith.extui %26 : vector<4x128xi1> to vector<4x128xi32>
    %28 = arith.sitofp %27 : vector<4x128xi32> to vector<4x128xf32>
    %29 = arith.mulf %3, %28 : vector<4x128xf32>
    %cst_9 = arith.constant dense<0.000000e+00> : vector<128xf32>
    %30 = vector.multi_reduction <add>, %29, %cst_9 [0] : vector<4x128xf32> to vector<128xf32>
    %31 = vector.shape_cast %30 : vector<128xf32> to vector<1x128xf32>
    %cst_10 = arith.constant dense<0.000000e+00> : vector<128xf32>
    %32 = vector.multi_reduction <add>, %4, %cst_10 [0] : vector<4x128xf32> to vector<128xf32>
    %33 = vector.shape_cast %32 : vector<128xf32> to vector<1x128xf32>
    %34 = arith.subf %14, %31 : vector<1x128xf32>
    %cst_11 = arith.constant 2.500000e-01 : f32
    %35 = vector.broadcast %cst_11 : f32 to vector<1x128xf32>
    %36 = arith.mulf %33, %35 : vector<1x128xf32>
    %37 = arith.subf %23, %36 : vector<1x128xf32>
    %c1_i32 = arith.constant 1 : i32
    %38 = arith.muli %arg0, %c1_i32 : i32
    %39 = arith.addi %38, %arg1 : i32
    %c128_i32 = arith.constant 128 : i32
    %40 = arith.muli %39, %c128_i32 : i32
    %c128_i32_12 = arith.constant 128 : i32
    %41 = arith.addi %40, %c128_i32_12 : i32
    %c8_i32 = arith.constant 8 : i32
    %42 = arith.cmpi sgt, %41, %c8_i32 : i32
    %true = arith.constant true
    %43 = arith.xori %42, %true : i1
    %44 = arith.extui %43 : i1 to i32
    %c0_i32_13 = arith.constant 0 : i32
    %45 = arith.cmpi ne, %44, %c0_i32_13 : i32
    scf.if %45 {
      %c0_15 = arith.constant 0 : index
      %c0_16 = arith.constant 0 : index
      %c0_17 = arith.constant 0 : index
      %48 = vector.load %arg5[%c0_15, %c0_16, %c0_17] : memref<1x2x128xf32, #tpu.memory_space<vmem>>, vector<1x1x128xf32>
      %49 = vector.shape_cast %48 : vector<1x1x128xf32> to vector<1x128xf32>
      %50 = arith.addf %49, %34 : vector<1x128xf32>
      %c0_18 = arith.constant 0 : index
      %c0_19 = arith.constant 0 : index
      %c0_20 = arith.constant 0 : index
      %51 = vector.load %arg5[%c0_18, %c0_19, %c0_20] : memref<1x2x128xf32, #tpu.memory_space<vmem>>, vector<1x1x128xf32>
      %52 = vector.shape_cast %51 : vector<1x1x128xf32> to vector<1x128xf32>
      %53 = vector.shape_cast %50 : vector<1x128xf32> to vector<1x1x128xf32>
      tpu.vector_store %arg5[%c0_18, %c0_19, %c0_20], %53 {strides = array<i32>} : memref<1x2x128xf32, #tpu.memory_space<vmem>>, vector<1x1x128xf32>,
      %c0_21 = arith.constant 0 : index
      %c1 = arith.constant 1 : index
      %c0_22 = arith.constant 0 : index
      %54 = vector.load %arg5[%c0_21, %c1, %c0_22] : memref<1x2x128xf32, #tpu.memory_space<vmem>>, vector<1x1x128xf32>
      %55 = vector.shape_cast %54 : vector<1x1x128xf32> to vector<1x128xf32>
      %56 = arith.addf %55, %37 : vector<1x128xf32>
      %c0_23 = arith.constant 0 : index
      %c1_24 = arith.constant 1 : index
      %c0_25 = arith.constant 0 : index
      %57 = vector.load %arg5[%c0_23, %c1_24, %c0_25] : memref<1x2x128xf32, #tpu.memory_space<vmem>>, vector<1x1x128xf32>
      %58 = vector.shape_cast %57 : vector<1x1x128xf32> to vector<1x128xf32>
      %59 = vector.shape_cast %56 : vector<1x128xf32> to vector<1x1x128xf32>
      tpu.vector_store %arg5[%c0_23, %c1_24, %c0_25], %59 {strides = array<i32>} : memref<1x2x128xf32, #tpu.memory_space<vmem>>, vector<1x1x128xf32>,
    } else {
    }
    %46 = arith.extui %42 : i1 to i32
    %c0_i32_14 = arith.constant 0 : i32
    %47 = arith.cmpi ne, %46, %c0_i32_14 : i32
    scf.if %47 {
      %48 = tpu.iota {dimensions = array<i32: 1>} : vector<1x128xi32>
      %49 = vector.broadcast %40 : i32 to vector<1x128xi32>
      %50 = arith.addi %49, %48 : vector<1x128xi32>
      %c8_i32_15 = arith.constant 8 : i32
      %51 = vector.broadcast %c8_i32_15 : i32 to vector<1x128xi32>
      %52 = arith.cmpi slt, %50, %51 : vector<1x128xi32>
      %53 = arith.extui %52 : vector<1x128xi1> to vector<1x128xi32>
      %54 = arith.sitofp %53 : vector<1x128xi32> to vector<1x128xf32>
      %c0_16 = arith.constant 0 : index
      %c0_17 = arith.constant 0 : index
      %c0_18 = arith.constant 0 : index
      %55 = vector.load %arg5[%c0_16, %c0_17, %c0_18] : memref<1x2x128xf32, #tpu.memory_space<vmem>>, vector<1x1x128xf32>
      %56 = vector.shape_cast %55 : vector<1x1x128xf32> to vector<1x128xf32>
      %57 = arith.mulf %34, %54 : vector<1x128xf32>
      %58 = arith.addf %56, %57 : vector<1x128xf32>
      %c0_19 = arith.constant 0 : index
      %c0_20 = arith.constant 0 : index
      %c0_21 = arith.constant 0 : index
      %59 = vector.load %arg5[%c0_19, %c0_20, %c0_21] : memref<1x2x128xf32, #tpu.memory_space<vmem>>, vector<1x1x128xf32>
      %60 = vector.shape_cast %59 : vector<1x1x128xf32> to vector<1x128xf32>
      %61 = vector.shape_cast %58 : vector<1x128xf32> to vector<1x1x128xf32>
      tpu.vector_store %arg5[%c0_19, %c0_20, %c0_21], %61 {strides = array<i32>} : memref<1x2x128xf32, #tpu.memory_space<vmem>>, vector<1x1x128xf32>,
      %c0_22 = arith.constant 0 : index
      %c1 = arith.constant 1 : index
      %c0_23 = arith.constant 0 : index
      %62 = vector.load %arg5[%c0_22, %c1, %c0_23] : memref<1x2x128xf32, #tpu.memory_space<vmem>>, vector<1x1x128xf32>
      %63 = vector.shape_cast %62 : vector<1x1x128xf32> to vector<1x128xf32>
      %64 = arith.mulf %37, %54 : vector<1x128xf32>
      %65 = arith.addf %63, %64 : vector<1x128xf32>
      %c0_24 = arith.constant 0 : index
      %c1_25 = arith.constant 1 : index
      %c0_26 = arith.constant 0 : index
      %66 = vector.load %arg5[%c0_24, %c1_25, %c0_26] : memref<1x2x128xf32, #tpu.memory_space<vmem>>, vector<1x1x128xf32>
      %67 = vector.shape_cast %66 : vector<1x1x128xf32> to vector<1x128xf32>
      %68 = vector.shape_cast %65 : vector<1x128xf32> to vector<1x1x128xf32>
      tpu.vector_store %arg5[%c0_24, %c1_25, %c0_26], %68 {strides = array<i32>} : memref<1x2x128xf32, #tpu.memory_space<vmem>>, vector<1x1x128xf32>,
    } else {
    }
    return
  }
  func.func @transform_0(%arg0: i32, %arg1: i32) -> (i32, i32) {
    %c1_i32 = arith.constant 1 : i32
    %0 = arith.muli %arg0, %c1_i32 : i32
    %1 = arith.addi %0, %arg1 : i32
    %c0_i32 = arith.constant 0 : i32
    %c0_i32_0 = arith.constant 0 : i32
    return %c0_i32, %1 : i32, i32
  }
  func.func @transform_1(%arg0: i32, %arg1: i32) -> (i32, i32) {
    %c1_i32 = arith.constant 1 : i32
    %0 = arith.muli %arg0, %c1_i32 : i32
    %1 = arith.addi %0, %arg1 : i32
    %c0_i32 = arith.constant 0 : i32
    %c0_i32_0 = arith.constant 0 : i32
    return %c0_i32, %1 : i32, i32
  }
  func.func @transform_2(%arg0: i32, %arg1: i32) -> (i32, i32) {
    %c1_i32 = arith.constant 1 : i32
    %0 = arith.muli %arg0, %c1_i32 : i32
    %1 = arith.addi %0, %arg1 : i32
    %c0_i32 = arith.constant 0 : i32
    %c0_i32_0 = arith.constant 0 : i32
    return %c0_i32, %1 : i32, i32
  }
  func.func @transform_3(%arg0: i32, %arg1: i32) -> (i32, i32, i32) {
    %c0_i32 = arith.constant 0 : i32
    %c0_i32_0 = arith.constant 0 : i32
    %c0_i32_1 = arith.constant 0 : i32
    return %arg0, %c0_i32, %c0_i32_0 : i32, i32, i32
  }
}

</mosaic_0001>

<bundles_post_ra>
// kernel: tpu_custom_call.1
= control target key start
LH: loop header
LB: loop body
LE: loop exit
PB: predicated region body
PF: predicated region fallthrough
CT: control target
= control target key end

     0   :  { %8 = vsyncpa [#allocation3], 0  ;;  %s347_s0 = inlined_call_operand.hbm [shape: f32[4,128], index: 0, kind: input, shape index: {}]   ;;  %s348_s1 = inlined_call_operand.hbm [shape: f32[4,128], index: 1, kind: input, shape index: {}]   ;;  %s349_s2 = inlined_call_operand.vmem [shape: s32[1,128], index: 2, kind: input, shape index: {}]   ;;  %s350_s3 = inlined_call_operand.hbm [shape: f32[1,2,128], index: 3, kind: output, shape index: {}]  }
   0x1   :  { %9 = vsyncpa [#allocation6], 0 }
   0x2   :  { %10 = vsyncpa [#allocation4], 0  ;;  %s275_s12 = smov [#allocation2]   ;;  %s276_s14 = smov [#allocation5]  }
   0x3   :  { %s20_s13 = sshll.u32 %s275_s12, 4  ;;  %s33_s15 = sshll.u32 %s276_s14, 4  ;;  %s21_s13 = int_to_ptr.vmem [resolvable:$true] %s20_s13  ;;  %s34_s15 = int_to_ptr.vmem [resolvable:$true] %s33_s15 }
   0x4   :  { %s203_s18 = scalar_lea.hbm %s347_s0, 64 }
   0x5   :  { %p204_p0 = scmp.ne.s32.totalorder %s347_s0, %s203_s18  ;;  %p207_p1 = scmp.lt.u32.totalorder %s203_s18, %s347_s0 }
   0x7   :  { %p209_p2 = pnand %p207_p1, %p204_p0 }
   0x9   :  { %212 = shalt.err (!%p209_p2)
}
   0xa   :  { %s213_s23 = scalar_lea.vmem %s21_s13, 64  ;;  %p218_p4 = scmp.lt.s32.totalorder %s21_s13, %s21_s13 }
   0xb   :  { %p214_p3 = scmp.ne.s32.totalorder %s21_s13, %s213_s23  ;;  %p219_p5 = scmp.lt.s32.totalorder %s213_s23, %s213_s23 }
   0xd   :  { %p220_p6 = por %p219_p5, %p218_p4 }
   0xf   :  { %p221_p7 = pnand %p220_p6, %p214_p3 }
  0x11   :  { %224 = shalt.err (!%p221_p7)
}
  0x12   :  { %23 = dma.hbm_to_vmem [thread:$0]  %s347_s0, 64, %s21_s13, [#allocation3]  }
  0x13   :  { %s225_s28 = scalar_lea.hbm %s348_s1, 64 }
  0x14   :  { %p226_p8 = scmp.ne.s32.totalorder %s348_s1, %s225_s28  ;;  %p229_p9 = scmp.lt.u32.totalorder %s225_s28, %s348_s1 }
  0x16   :  { %p231_p10 = pnand %p229_p9, %p226_p8 }
  0x18   :  { %234 = shalt.err (!%p231_p10)
}
  0x19   :  { %s235_s6 = scalar_lea.vmem %s34_s15, 64  ;;  %p240_p12 = scmp.lt.s32.totalorder %s34_s15, %s34_s15 }
  0x1a   :  { %p236_p11 = scmp.ne.s32.totalorder %s34_s15, %s235_s6  ;;  %p241_p13 = scmp.lt.s32.totalorder %s235_s6, %s235_s6 }
  0x1c   :  { %p242_p0 = por %p241_p13, %p240_p12 }
  0x1e   :  { %p243_p1 = pnand %p242_p0, %p236_p11 }
  0x20   :  { %246 = shalt.err (!%p243_p1)
}
  0x21   :  { %36 = dma.hbm_to_vmem [thread:$0]  %s348_s1, 64, %s34_s15, [#allocation6]  }
  0x22   :  { %269 = dma.done.wait [#allocation3], 64  }
  0x23   :  { %270 = vsyncadd [#allocation3], 4294967232 }
  0x24   :  { %271 = dma.done.wait [#allocation6], 64  }
  0x25   :  { %272 = vsyncadd [#allocation6], 4294967232  ;;  %v277_v0 = vmov 0.0   ;;  %vm69_vm0 = vcmask 1043456   ;;  %v66_v1 = vld [vmem:[#allocation2] sm:$0xf]  ;;  %v110_v17 = vlaneseq }
  0x26   :  { %65 = vst [vmem:[#allocation7] sm:$0x3] %v277_v0  ;;  %v67_v2 = vld [vmem:[#allocation5] sm:$0xf]  ;;  %v70_v3 = vsel %vm69_vm0, %v66_v1, -inf }
  0x27   :  { %v90_v4 = vsel %vm69_vm0, %v67_v2, -inf  ;;  %v71_v5 = vrot.slane %v70_v3, 4  ;;  %v111_v22 = vshrl.u32 %v110_v17, 7  ;;  %v188_v23 = vld [vmem:[%s349_s2] ss:$0 sm:$0xff]  ;;  %v127_v26 = vsel %vm69_vm0, %v67_v2, 0.0 }
  0x28   :  { %v91_v6 = vrot.slane %v90_v4, 4  ;;  %v128_v33 = vrot.slane %v127_v26, 4  ;;  %v155_v54 = vand.u32 127, %v110_v17  ;;  %s278_s2 = smov [#allocation7]  }
  0x29   :  { %v72_v7 = vmax.f32 %v70_v3, %v71_v5  ;;  %vm116_vm1 = vcmp.eq.s32.totalorder %v111_v22, %v188_v23  ;;  %s175_s9 = sshll.u32 %s278_s2, 4  ;;  %s176_s9 = int_to_ptr.vmem [resolvable:$true] %s175_s9 }
  0x2a   :  { %v92_v8 = vmax.f32 %v90_v4, %v91_v6  ;;  %v189_v24 = vsel %vm116_vm1, 1.0, %v277_v0  ;;  %v129_v39 = vadd.f32 %v128_v33, %v127_v26  ;;  %vm158_vm2 = vcmp.lt.s32.totalorder %v155_v54, 8  ;;  %s247_s10 = scalar_lea.vmem %s176_s9, 32  ;;  %p252_p3 = scmp.lt.s32.totalorder %s176_s9, %s176_s9 }
  0x2b   :  { %v73_v9 = vrot.slane %v72_v7, 2  ;;  %v119_v25 = vmul.f32 %v189_v24, %v66_v1  ;;  %p248_p2 = scmp.ne.s32.totalorder %s176_s9, %s247_s10  ;;  %p253_p4 = scmp.lt.s32.totalorder %s247_s10, %s247_s10 }
  0x2c   :  { %v93_v10 = vrot.slane %v92_v8, 2  ;;  %v130_v45 = vrot.slane %v129_v39, 2 }
  0x2d   :  { %v74_v11 = vmax.f32 %v72_v7, %v73_v9  ;;  %v120_v32 = vsel %vm69_vm0, %v119_v25, 0.0  ;;  %v161_v4 = vld [vmem:[#allocation7] sm:$0x1]  ;;  %v165_v6 = vld [vmem:[#allocation7 + $0x1] sm:$0x1]  ;;  %p254_p5 = por %p253_p4, %p252_p3 }
  0x2e   :  { %v94_v12 = vmax.f32 %v92_v8, %v93_v10  ;;  %v121_v37 = vrot.slane %v120_v32, 4  ;;  %v131_v50 = vadd.f32 %v130_v45, %v129_v39 }
  0x2f   :  { %v75_v13 = vrot.slane %v74_v11, 1  ;;  %p255_p6 = pnand %p254_p5, %p248_p2 }
  0x30   :  { %v95_v14 = vrot.slane %v94_v12, 1  ;;  %v122_v43 = vadd.f32 %v121_v37, %v120_v32  ;;  %v132_v52 = vrot.slane %v131_v50, 1 }
  0x31   :  { %v76_v15 = vmax.f32 %v74_v11, %v75_v13 }
  0x32   :  { %v96_v16 = vmax.f32 %v94_v12, %v95_v14  ;;  %v123_v49 = vrot.slane %v122_v43, 2  ;;  %v133_v55 = vadd.f32 %v132_v52, %v131_v50 }
  0x33   :  { %v77_v18 = vsub.f32 %v66_v1, %v76_v15  ;;  %v190_v1 = vsel %vm158_vm2, 1.0, %v277_v0 }
  0x34   :  { %v97_v19 = vsub.f32 %v67_v2, %v96_v16  ;;  %v124_v51 = vadd.f32 %v123_v49, %v122_v43  ;;  %v135_v61 = vmul.f32 0.25, %v133_v55 }
  0x35   :  { %v78_v20 = vmul.f32 1.442695, %v77_v18 }
  0x36   :  { %v98_v21 = vmul.f32 1.442695, %v97_v19  ;;  %v125_v53 = vrot.slane %v124_v51, 1 }
  0x37   :  { %195 = vpow2.f32 %v78_v20 }
  0x38   :  { %197 = vpow2.f32 %v98_v21  ;;  %v126_v59 = vadd.f32 %v125_v53, %v124_v51 }
  0x41   :  { %v196_v27 = vpop.eup %195 }
  0x42   :  { %v198_v28 = vpop.eup %197  ;;  %v80_v29 = vsel %vm69_vm0, %v196_v27, 0.0 }
  0x43   :  { %v81_v30 = vrot.slane %v80_v29, 4  ;;  %v100_v31 = vsel %vm69_vm0, %v198_v28, 0.0 }
  0x44   :  { %v101_v34 = vrot.slane %v100_v31, 4 }
  0x45   :  { %v82_v35 = vadd.f32 %v81_v30, %v80_v29 }
  0x46   :  { %v102_v36 = vadd.f32 %v101_v34, %v100_v31 }
  0x47   :  { %v83_v38 = vrot.slane %v82_v35, 2 }
  0x48   :  { %v103_v40 = vrot.slane %v102_v36, 2 }
  0x49   :  { %v84_v41 = vadd.f32 %v83_v38, %v82_v35 }
  0x4a   :  { %v104_v42 = vadd.f32 %v103_v40, %v102_v36 }
  0x4b   :  { %v85_v44 = vrot.slane %v84_v41, 1 }
  0x4c   :  { %v105_v46 = vrot.slane %v104_v42, 1 }
  0x4d   :  { %v86_v47 = vadd.f32 %v85_v44, %v84_v41 }
  0x4e   :  { %v106_v48 = vadd.f32 %v105_v46, %v104_v42 }
  0x4f   :  { %199 = vlog2.f32 %v86_v47 }
  0x50   :  { %201 = vlog2.f32 %v106_v48 }
  0x59   :  { %v200_v56 = vpop.eup %199 }
  0x5a   :  { %v202_v57 = vpop.eup %201  ;;  %v88_v58 = vmul.f32 0.6931472, %v200_v56 }
  0x5b   :  { %v108_v60 = vmul.f32 0.6931472, %v202_v57 }
  0x5c   :  { %v89_v62 = vadd.f32 %v88_v58, %v76_v15 }
  0x5d   :  { %v109_v63 = vadd.f32 %v108_v60, %v96_v16 }
  0x5e   :  { %v134_v2 = vsub.f32 %v89_v62, %v126_v59 }
  0x5f   :  { %v136_v3 = vsub.f32 %v109_v63, %v135_v61 }
  0x60   :  { %v162_v5 = vmul.f32 %v190_v1, %v134_v2 }
  0x61   :  { %v166_v7 = vmul.f32 %v190_v1, %v136_v3 }
  0x62   :  { %v163_v8 = vadd.f32 %v162_v5, %v161_v4 }
  0x63   :  { %v167_v9 = vadd.f32 %v166_v7, %v165_v6 }
  0x64   :  { %164 = vst [vmem:[#allocation7] sm:$0x1] %v163_v8 }
  0x65   :  { %168 = vst [vmem:[#allocation7 + $0x1] sm:$0x1] %v167_v9 }
  0x66   :  { %258 = shalt.err (!%p255_p6)
}
  0x67   :  { %s259_s13 = scalar_lea.hbm %s350_s3, 32 }
  0x68   :  { %p260_p7 = scmp.ne.s32.totalorder %s350_s3, %s259_s13  ;;  %p263_p8 = scmp.lt.u32.totalorder %s259_s13, %s350_s3 }
  0x6a   :  { %p265_p9 = pnand %p263_p8, %p260_p7 }
  0x6c   :  { %268 = shalt.err (!%p265_p9)
}
  0x6d   :  { %178 = dma.vmem_to_hbm [thread:$0]  %s176_s9, 32, %s350_s3, [#allocation4]  }
  0x6e   :  { %273 = dma.done.wait [#allocation4], 32  }
  0x6f   :  { %274 = vsyncadd [#allocation4], 4294967264 }
  0x70   :  { %182 = vsyncpa [#allocation3], 1 }
  0x71   :  { %183 = vsyncpa [#allocation6], 1 }
  0x72   :  { %184 = vsyncpa [#allocation4], 1 }

</bundles_post_ra>
